<compile_context>
chip_gen: v7x
topology: tpu7x:2x2x1
jax: 0.10.0
libtpu: 0.0.40
codegen_flags: <defaults>
</compile_context>

<pallas_src>
import functools

import jax
import jax.numpy as jnp
import numpy as np
from jax import lax
from jax.experimental import pallas as pl
from jax.experimental.pallas import tpu as pltpu  # noqa: F401  (TPU backend)

LANES = 128


# ---------------------------------------------------------------------------
# Fused forward kernel
# ---------------------------------------------------------------------------
def fused_forward_kernel(slab_ref, x_comp_ref, idx_ref, out_ref, *,
                         layout, T, B, H, VP):
    f32 = jnp.float32

    def w(name):
        off, r, c = layout[name]
        return slab_ref[off:off + r, :c]

    # ---- comp branch: (linear with BN folded into W,b -> relu) x 2 --------
    x = x_comp_ref[...]
    o1 = jnp.maximum(
        jnp.dot(x, w("c_w1"), preferred_element_type=f32) + w("c_b1"), 0.0)
    out2_comp = jnp.maximum(
        jnp.dot(o1, w("c_w2"), preferred_element_type=f32) + w("c_b2"), 0.0)

    # ---- embedding gather fused with LSTM input projection -----------------
    # one_hot(idx) @ (emb_table @ W_ih): single lane-dense (T*B, 4H) matmul.
    idx = idx_ref[...]                                         # (T*B, 1) int32
    lane_v = lax.broadcasted_iota(jnp.int32, (T * B, VP), 1)
    onehot = (jnp.broadcast_to(idx, (T * B, VP)) == lane_v).astype(f32)
    xproj = (jnp.dot(onehot, w("wemb_ih"), preferred_element_type=f32)
             + w("bg"))                                        # (T*B, 4H), vregs

    # ---- LSTM recurrence (T static -> fully unrolled) ----------------------
    whh = w("whh")                                             # (H, 4H)
    glane = lax.broadcasted_iota(jnp.int32, (B, 4 * H), 1)
    g_mask = (glane >= 2 * H) & (glane < 3 * H)                # tanh lanes (g)
    h = jnp.zeros((B, H), f32)
    c = jnp.zeros((B, H), f32)
    for t in range(T):
        gates = xproj[t * B:(t + 1) * B, :] + jnp.dot(
            h, whh, preferred_element_type=f32)                # (B, 4H)
        # 2 whole-vreg EUP passes (sigmoid + tanh) selected by lane mask,
        # instead of 4 separately-sliced activations.
        act = jnp.where(g_mask, jnp.tanh(gates), jax.nn.sigmoid(gates))
        i_g = act[:, 0 * H:1 * H]
        f_g = act[:, 1 * H:2 * H]
        g_g = act[:, 2 * H:3 * H]
        o_g = act[:, 3 * H:4 * H]
        c = f_g * c + i_g * g_g
        h = o_g * jnp.tanh(c)
    # dropout(0.3) on lstm_out -> identity (eval); last step of a 1-layer
    # unidirectional LSTM equals h.

    # ---- head: fc folded into combined layer-1 target weight ---------------
    z1 = (jnp.dot(out2_comp, w("m_w1a"), preferred_element_type=f32)
          + jnp.dot(h, w("m_w1b"), preferred_element_type=f32)
          + w("m_b1"))
    o1h = jnp.maximum(z1, 0.0)
    o2h = jnp.maximum(
        jnp.dot(o1h, w("m_w2"), preferred_element_type=f32) + w("m_b2"), 0.0)
    # Output weight zero-padded to 128 lanes -> lane-dense store of y.
    y = jnp.dot(o2h, w("o_w"), preferred_element_type=f32) + w("o_b")  # (B,128)

    # ---- single packed lane-dense output: rows [0:B]=y, [B:2B]=[h|c|pad] ---
    hc = jnp.concatenate([h, c, jnp.zeros((B, LANES - 2 * H), f32)], axis=1)
    out_ref[...] = jnp.concatenate([y, hc], axis=0)


def run_fused(slab, x_comp, idx_tm, *, layout, T, B, H, VP):
    kernel = functools.partial(fused_forward_kernel,
                               layout=layout, T=T, B=B, H=H, VP=VP)
    return pl.pallas_call(
        kernel,
        out_shape=jax.ShapeDtypeStruct((2 * B, LANES), jnp.float32),
    )(slab, x_comp, idx_tm)
    # NOTE: at B=2 a grid / dual-TC split (v7x) would be pure overhead; for
    # larger batches add a leading batch grid axis with
    # dimension_semantics=("parallel",).


# ---------------------------------------------------------------------------
# One-time host-side weight preparation (kept OUT of the per-call jit path)
# ---------------------------------------------------------------------------
def prepare_slab(p, *, hidden_dim):
    """BN fold, fc fold, embedding @ W_ih fusion, transposes and lane padding,
    packed into a single (rows, 128) f32 slab + static layout dict."""
    eps = 1e-5
    s = float(1.0 / np.sqrt(1.0 + eps))      # identity-BN fold (fresh stats)
    H = hidden_dim

    def A(x):
        return np.asarray(x, np.float32)

    # comp FC_2_Layer (BN folded into weight & bias)
    c_w1 = A(p["c_w1"]).T * s                       # (n_comp, comp_l1)
    c_b1 = (A(p["c_b1"]) * s)[None, :]
    c_w2 = A(p["c_w2"]).T * s                       # (comp_l1, comp_l2)
    c_b2 = (A(p["c_b2"]) * s)[None, :]

    # Embedding fused with LSTM input projection (gate order i,f,g,o stacked)
    wih = A(p["w_ih"]).T                            # (E, 4H)
    wemb_ih = A(p["emb"]) @ wih                     # (vocab, 4H)
    vocab = wemb_ih.shape[0]
    VP = ((vocab + 7) // 8) * 8
    wemb_ih = np.pad(wemb_ih, ((0, VP - vocab), (0, 0)))
    bg = (A(p["b_ih"]) + A(p["b_hh"]))[None, :]     # (1, 4H)
    whh = A(p["w_hh"]).T                            # (H, 4H)

    # Combined FC_2_Layer (BN folded) with fc folded into its target half:
    #   out_tar @ W1b == h @ (fc_w^T @ W1b) + fc_b @ W1b
    m_w1 = A(p["m_w1"]).T * s                       # (comp_l2+out, fc_l1)
    comp_l2 = A(p["c_w2"]).shape[0]
    m_w1a = m_w1[:comp_l2, :]                       # (comp_l2, fc_l1)
    m_w1b_raw = m_w1[comp_l2:, :]                   # (out_size, fc_l1)
    m_w1b = A(p["fc_w"]).T @ m_w1b_raw              # (H, fc_l1)
    m_b1 = (A(p["m_b1"]) * s + A(p["fc_b"]) @ m_w1b_raw)[None, :]
    m_w2 = A(p["m_w2"]).T * s                       # (fc_l1, fc_l2)
    m_b2 = (A(p["m_b2"]) * s)[None, :]

    # Output head, zero-padded to 128 lanes (lane-dense store; wrapper slices)
    fc_l2 = A(p["o_w"]).shape[1]
    o_w = np.zeros((fc_l2, LANES), np.float32)
    o_w[:, 0] = A(p["o_w"])[0]
    o_b = np.zeros((1, LANES), np.float32)
    o_b[0, 0] = float(A(p["o_b"])[0])

    pieces = [("c_w1", c_w1), ("c_b1", c_b1), ("c_w2", c_w2), ("c_b2", c_b2),
              ("wemb_ih", wemb_ih), ("bg", bg), ("whh", whh),
              ("m_w1a", m_w1a), ("m_w1b", m_w1b), ("m_b1", m_b1),
              ("m_w2", m_w2), ("m_b2", m_b2), ("o_w", o_w), ("o_b", o_b)]

    layout = {}
    rows = 0
    for name, arr in pieces:
        r, c = arr.shape
        layout[name] = (rows, r, c)
        rows += ((r + 7) // 8) * 8            # 8-row alignment per piece
    slab = np.zeros((rows, LANES), np.float32)
    for name, arr in pieces:
        off, r, c = layout[name]
        slab[off:off + r, :c] = arr
    return jnp.asarray(slab), layout, VP


# ---------------------------------------------------------------------------
# Per-call forward (jitted): tiny index transpose + one pallas_call + slices
# ---------------------------------------------------------------------------
def comp_fcnn_tar_rnn_forward(slab, x_comp, x_tar, *, layout, hidden_dim,
                              vocab_pad):
    B, T = x_tar.shape
    H = hidden_dim
    # Time-major flattened indices (row = t*B + b); only the tiny int matrix
    # is transposed per call — the embedding gather itself happens in-kernel.
    idx_tm = jnp.transpose(x_tar.astype(jnp.int32)).reshape(T * B, 1)
    out = run_fused(slab, x_comp, idx_tm, layout=layout,
                    T=T, B=B, H=H, VP=vocab_pad)
    y_pred = out[:B, :1]
    h_n = out[B:2 * B, 0 * H:1 * H]
    c_n = out[B:2 * B, 1 * H:2 * H]
    return y_pred, (h_n[None], c_n[None])     # (n_layers=1, B, H) each


# ---------------------------------------------------------------------------
# Parameter construction (deterministic, synthetic)
# ---------------------------------------------------------------------------
def make_params(key, n_comp, comp_l1, comp_l2, vocab, out_size, emb_dim,
                hidden, fc_l1, fc_l2):
    keys = iter(jax.random.split(key, 32))

    def w(shape, scale=0.1):
        return jax.random.normal(next(keys), shape, jnp.float32) * scale

    p = {}
    p["c_w1"] = w((comp_l1, n_comp));  p["c_b1"] = w((comp_l1,))
    p["c_w2"] = w((comp_l2, comp_l1)); p["c_b2"] = w((comp_l2,))
    p["emb"] = w((vocab, emb_dim), 1.0)
    p["w_ih"] = w((4 * hidden, emb_dim)); p["b_ih"] = w((4 * hidden,))
    p["w_hh"] = w((4 * hidden, hidden));  p["b_hh"] = w((4 * hidden,))
    p["fc_w"] = w((out_size, hidden)); p["fc_b"] = w((out_size,))
    p["m_w1"] = w((fc_l1, comp_l2 + out_size)); p["m_b1"] = w((fc_l1,))
    p["m_w2"] = w((fc_l2, fc_l1));              p["m_b2"] = w((fc_l2,))
    p["o_w"] = w((1, fc_l2)); p["o_b"] = w((1,))
    return p


# ---------------------------------------------------------------------------
# Pure-JAX reference (same eval semantics) for correctness checking
# ---------------------------------------------------------------------------
def reference_forward(params, x_comp, x_tar, hidden_dim):
    p = params
    eps = 1e-5

    def fc2(x, w1, b1, w2, b2):
        o1 = jnp.maximum((x @ w1.T + b1) / jnp.sqrt(1.0 + eps), 0.0)
        o2 = jnp.maximum((o1 @ w2.T + b2) / jnp.sqrt(1.0 + eps), 0.0)
        return o2

    out2_comp = fc2(x_comp, p["c_w1"], p["c_b1"], p["c_w2"], p["c_b2"])

    embeds = jnp.take(p["emb"], x_tar.astype(jnp.int32), axis=0)
    embeds_tm = jnp.transpose(embeds, (1, 0, 2))
    H, E = hidden_dim, embeds.shape[-1]
    wih = jnp.transpose(p["w_ih"].reshape(4, H, E), (0, 2, 1))
    whh = jnp.transpose(p["w_hh"].reshape(4, H, H), (0, 2, 1))
    b_g = (p["b_ih"] + p["b_hh"]).reshape(4, 1, H)

    def step(carry, x_t):
        h, c = carry
        gate = lambda k: x_t @ wih[k] + h @ whh[k] + b_g[k]
        i = jax.nn.sigmoid(gate(0))
        f = jax.nn.sigmoid(gate(1))
        g = jnp.tanh(gate(2))
        o = jax.nn.sigmoid(gate(3))
        c = f * c + i * g
        h = o * jnp.tanh(c)
        return (h, c), None

    B = x_tar.shape[0]
    h0 = jnp.zeros((B, H), jnp.float32)
    (h_n, c_n), _ = lax.scan(step, (h0, h0), embeds_tm)

    out_tar = h_n @ p["fc_w"].T + p["fc_b"]
    combined = jnp.concatenate([out2_comp, out_tar], axis=1)
    out_comb = fc2(combined, p["m_w1"], p["m_b1"], p["m_w2"], p["m_b2"])
    y = out_comb @ p["o_w"].T + p["o_b"]
    return y, (h_n[None], c_n[None])


if __name__ == "__main__":
    # Small, module-consistent shapes.
    B, T = 2, 8
    n_comp, comp_l1, comp_l2 = 32, 64, 32
    vocab, out_size, emb_dim = 20, 8, 16
    hidden_dim, n_layers = 32, 1
    fc_l1, fc_l2 = 64, 32

    key = jax.random.PRNGKey(0)
    k_par, k_comp, k_tar = jax.random.split(key, 3)
    params = make_params(k_par, n_comp, comp_l1, comp_l2, vocab, out_size,
                         emb_dim, hidden_dim, fc_l1, fc_l2)
    x_comp = jax.random.normal(k_comp, (B, n_comp), jnp.float32)
    x_tar = jax.random.randint(k_tar, (B, T), 0, vocab, jnp.int32)

    # One-time weight prep (numpy, off the per-call jitted path).
    slab, layout, vocab_pad = prepare_slab(params, hidden_dim=hidden_dim)

    fwd = jax.jit(functools.partial(comp_fcnn_tar_rnn_forward, layout=layout,
                                    hidden_dim=hidden_dim,
                                    vocab_pad=vocab_pad))
    y_pred, (h_n, c_n) = fwd(slab, x_comp, x_tar)
    jax.block_until_ready((y_pred, h_n, c_n))

    y_ref, (h_ref, c_ref) = reference_forward(params, x_comp, x_tar, hidden_dim)
    assert y_pred.shape == (B, 1) and h_n.shape == (n_layers, B, hidden_dim)
    np.testing.assert_allclose(np.asarray(y_pred), np.asarray(y_ref),
                               rtol=1e-2, atol=1e-3)
    np.testing.assert_allclose(np.asarray(h_n), np.asarray(h_ref),
                               rtol=1e-2, atol=1e-3)
    np.testing.assert_allclose(np.asarray(c_n), np.asarray(c_ref),
                               rtol=1e-2, atol=1e-3)
    print("KERNEL_OK")
</pallas_src>

<mosaic_0001>
module attributes {stable_mosaic.version = 11 : i64} {
  func.func @fused_forward_kernel(%arg0: memref<360x128xf32, #tpu.memory_space<vmem>>, %arg1: memref<2x32xf32, #tpu.memory_space<vmem>>, %arg2: memref<16x1xi32, #tpu.memory_space<vmem>>, %arg3: memref<4x128xf32, #tpu.memory_space<vmem>>) attributes {dimension_semantics = [], scalar_prefetch = 0 : i64, scratch_operands = 0 : i64, tpu.core_type = #tpu.core_type<tc>} {
    %c0 = arith.constant 0 : index
    %c0_0 = arith.constant 0 : index
    %0 = vector.load %arg1[%c0, %c0_0] : memref<2x32xf32, #tpu.memory_space<vmem>>, vector<2x32xf32>
    %c0_1 = arith.constant 0 : index
    %c0_2 = arith.constant 0 : index
    %1 = vector.load %arg0[%c0_1, %c0_2] : memref<360x128xf32, #tpu.memory_space<vmem>>, vector<32x64xf32>
    %cst = arith.constant dense<0.000000e+00> : vector<2x64xf32>
    %2 = tpu.matmul %0, %1, %cst {dimension_numbers = #tpu.dot_dimension_numbers<[1], [0], [0], [1], [0, 0, 1, 1], [], []>} : vector<2x32xf32>, vector<32x64xf32>, vector<2x64xf32> -> vector<2x64xf32>
    %c32 = arith.constant 32 : index
    %c0_3 = arith.constant 0 : index
    %3 = vector.load %arg0[%c32, %c0_3] : memref<360x128xf32, #tpu.memory_space<vmem>>, vector<1x64xf32>
    %4 = vector.broadcast %3 : vector<1x64xf32> to vector<2x64xf32>
    %5 = arith.addf %2, %4 : vector<2x64xf32>
    %cst_4 = arith.constant 0.000000e+00 : f32
    %6 = vector.broadcast %cst_4 : f32 to vector<2x64xf32>
    %7 = arith.maximumf %5, %6 : vector<2x64xf32>
    %c40 = arith.constant 40 : index
    %c0_5 = arith.constant 0 : index
    %8 = vector.load %arg0[%c40, %c0_5] : memref<360x128xf32, #tpu.memory_space<vmem>>, vector<64x32xf32>
    %cst_6 = arith.constant dense<0.000000e+00> : vector<2x32xf32>
    %9 = tpu.matmul %7, %8, %cst_6 {dimension_numbers = #tpu.dot_dimension_numbers<[1], [0], [0], [1], [0, 0, 1, 1], [], []>} : vector<2x64xf32>, vector<64x32xf32>, vector<2x32xf32> -> vector<2x32xf32>
    %c104 = arith.constant 104 : index
    %c0_7 = arith.constant 0 : index
    %10 = vector.load %arg0[%c104, %c0_7] : memref<360x128xf32, #tpu.memory_space<vmem>>, vector<1x32xf32>
    %11 = vector.broadcast %10 : vector<1x32xf32> to vector<2x32xf32>
    %12 = arith.addf %9, %11 : vector<2x32xf32>
    %cst_8 = arith.constant 0.000000e+00 : f32
    %13 = vector.broadcast %cst_8 : f32 to vector<2x32xf32>
    %14 = arith.maximumf %12, %13 : vector<2x32xf32>
    %c0_9 = arith.constant 0 : index
    %c0_10 = arith.constant 0 : index
    %15 = vector.load %arg2[%c0_9, %c0_10] : memref<16x1xi32, #tpu.memory_space<vmem>>, vector<16x1xi32>
    %16 = tpu.iota {dimensions = array<i32: 1>} : vector<16x24xi32>
    %17 = vector.shape_cast %15 : vector<16x1xi32> to vector<16x1xi32>
    %18 = vector.broadcast %17 : vector<16x1xi32> to vector<16x24xi32>
    %19 = arith.cmpi eq, %18, %16 : vector<16x24xi32>
    %20 = arith.extui %19 : vector<16x24xi1> to vector<16x24xi32>
    %21 = arith.sitofp %20 : vector<16x24xi32> to vector<16x24xf32>
    %c112 = arith.constant 112 : index
    %c0_11 = arith.constant 0 : index
    %22 = vector.load %arg0[%c112, %c0_11] : memref<360x128xf32, #tpu.memory_space<vmem>>, vector<24x128xf32>
    %cst_12 = arith.constant dense<0.000000e+00> : vector<16x128xf32>
    %23 = tpu.matmul %21, %22, %cst_12 {dimension_numbers = #tpu.dot_dimension_numbers<[1], [0], [0], [1], [0, 0, 1, 1], [], []>} : vector<16x24xf32>, vector<24x128xf32>, vector<16x128xf32> -> vector<16x128xf32>
    %c136 = arith.constant 136 : index
    %c0_13 = arith.constant 0 : index
    %24 = vector.load %arg0[%c136, %c0_13] : memref<360x128xf32, #tpu.memory_space<vmem>>, vector<1x128xf32>
    %25 = vector.broadcast %24 : vector<1x128xf32> to vector<16x128xf32>
    %26 = arith.addf %23, %25 : vector<16x128xf32>
    %c144 = arith.constant 144 : index
    %c0_14 = arith.constant 0 : index
    %27 = vector.load %arg0[%c144, %c0_14] : memref<360x128xf32, #tpu.memory_space<vmem>>, vector<32x128xf32>
    %28 = tpu.iota {dimensions = array<i32: 1>} : vector<2x128xi32>
    %c64_i32 = arith.constant 64 : i32
    %29 = vector.broadcast %c64_i32 : i32 to vector<2x128xi32>
    %30 = arith.cmpi sge, %28, %29 : vector<2x128xi32>
    %c96_i32 = arith.constant 96 : i32
    %31 = vector.broadcast %c96_i32 : i32 to vector<2x128xi32>
    %32 = arith.cmpi slt, %28, %31 : vector<2x128xi32>
    %33 = arith.andi %30, %32 : vector<2x128xi1>
    %cst_15 = arith.constant 0.000000e+00 : f32
    %34 = vector.broadcast %cst_15 : f32 to vector<2x32xf32>
    %cst_16 = arith.constant 0.000000e+00 : f32
    %35 = vector.broadcast %cst_16 : f32 to vector<2x32xf32>
    %36 = vector.extract_strided_slice %26 {offsets = [0, 0], sizes = [2, 128], strides = [1, 1]} : vector<16x128xf32> to vector<2x128xf32>
    %cst_17 = arith.constant dense<0.000000e+00> : vector<2x128xf32>
    %37 = tpu.matmul %34, %27, %cst_17 {dimension_numbers = #tpu.dot_dimension_numbers<[1], [0], [0], [1], [0, 0, 1, 1], [], []>} : vector<2x32xf32>, vector<32x128xf32>, vector<2x128xf32> -> vector<2x128xf32>
    %38 = arith.addf %36, %37 : vector<2x128xf32>
    %39 = math.tanh %38 : vector<2x128xf32>
    %40 = arith.negf %38 : vector<2x128xf32>
    %41 = math.exp %40 : vector<2x128xf32>
    %cst_18 = arith.constant 1.000000e+00 : f32
    %42 = vector.broadcast %cst_18 : f32 to vector<2x128xf32>
    %43 = arith.addf %42, %41 : vector<2x128xf32>
    %44 = arith.divf %42, %43 : vector<2x128xf32>
    %45 = arith.select %33, %39, %44 : vector<2x128xi1>, vector<2x128xf32>
    %46 = vector.extract_strided_slice %45 {offsets = [0, 0], sizes = [2, 32], strides = [1, 1]} : vector<2x128xf32> to vector<2x32xf32>
    %47 = vector.extract_strided_slice %45 {offsets = [0, 32], sizes = [2, 32], strides = [1, 1]} : vector<2x128xf32> to vector<2x32xf32>
    %48 = vector.extract_strided_slice %45 {offsets = [0, 64], sizes = [2, 32], strides = [1, 1]} : vector<2x128xf32> to vector<2x32xf32>
    %49 = vector.extract_strided_slice %45 {offsets = [0, 96], sizes = [2, 32], strides = [1, 1]} : vector<2x128xf32> to vector<2x32xf32>
    %50 = arith.mulf %47, %35 : vector<2x32xf32>
    %51 = arith.mulf %46, %48 : vector<2x32xf32>
    %52 = arith.addf %50, %51 : vector<2x32xf32>
    %53 = math.tanh %52 : vector<2x32xf32>
    %54 = arith.mulf %49, %53 : vector<2x32xf32>
    %55 = vector.extract_strided_slice %26 {offsets = [2, 0], sizes = [2, 128], strides = [1, 1]} : vector<16x128xf32> to vector<2x128xf32>
    %cst_19 = arith.constant dense<0.000000e+00> : vector<2x128xf32>
    %56 = tpu.matmul %54, %27, %cst_19 {dimension_numbers = #tpu.dot_dimension_numbers<[1], [0], [0], [1], [0, 0, 1, 1], [], []>} : vector<2x32xf32>, vector<32x128xf32>, vector<2x128xf32> -> vector<2x128xf32>
    %57 = arith.addf %55, %56 : vector<2x128xf32>
    %58 = math.tanh %57 : vector<2x128xf32>
    %59 = arith.negf %57 : vector<2x128xf32>
    %60 = math.exp %59 : vector<2x128xf32>
    %cst_20 = arith.constant 1.000000e+00 : f32
    %61 = vector.broadcast %cst_20 : f32 to vector<2x128xf32>
    %62 = arith.addf %61, %60 : vector<2x128xf32>
    %63 = arith.divf %61, %62 : vector<2x128xf32>
    %64 = arith.select %33, %58, %63 : vector<2x128xi1>, vector<2x128xf32>
    %65 = vector.extract_strided_slice %64 {offsets = [0, 0], sizes = [2, 32], strides = [1, 1]} : vector<2x128xf32> to vector<2x32xf32>
    %66 = vector.extract_strided_slice %64 {offsets = [0, 32], sizes = [2, 32], strides = [1, 1]} : vector<2x128xf32> to vector<2x32xf32>
    %67 = vector.extract_strided_slice %64 {offsets = [0, 64], sizes = [2, 32], strides = [1, 1]} : vector<2x128xf32> to vector<2x32xf32>
    %68 = vector.extract_strided_slice %64 {offsets = [0, 96], sizes = [2, 32], strides = [1, 1]} : vector<2x128xf32> to vector<2x32xf32>
    %69 = arith.mulf %66, %52 : vector<2x32xf32>
    %70 = arith.mulf %65, %67 : vector<2x32xf32>
    %71 = arith.addf %69, %70 : vector<2x32xf32>
    %72 = math.tanh %71 : vector<2x32xf32>
    %73 = arith.mulf %68, %72 : vector<2x32xf32>
    %74 = vector.extract_strided_slice %26 {offsets = [4, 0], sizes = [2, 128], strides = [1, 1]} : vector<16x128xf32> to vector<2x128xf32>
    %cst_21 = arith.constant dense<0.000000e+00> : vector<2x128xf32>
    %75 = tpu.matmul %73, %27, %cst_21 {dimension_numbers = #tpu.dot_dimension_numbers<[1], [0], [0], [1], [0, 0, 1, 1], [], []>} : vector<2x32xf32>, vector<32x128xf32>, vector<2x128xf32> -> vector<2x128xf32>
    %76 = arith.addf %74, %75 : vector<2x128xf32>
    %77 = math.tanh %76 : vector<2x128xf32>
    %78 = arith.negf %76 : vector<2x128xf32>
    %79 = math.exp %78 : vector<2x128xf32>
    %cst_22 = arith.constant 1.000000e+00 : f32
    %80 = vector.broadcast %cst_22 : f32 to vector<2x128xf32>
    %81 = arith.addf %80, %79 : vector<2x128xf32>
    %82 = arith.divf %80, %81 : vector<2x128xf32>
    %83 = arith.select %33, %77, %82 : vector<2x128xi1>, vector<2x128xf32>
    %84 = vector.extract_strided_slice %83 {offsets = [0, 0], sizes = [2, 32], strides = [1, 1]} : vector<2x128xf32> to vector<2x32xf32>
    %85 = vector.extract_strided_slice %83 {offsets = [0, 32], sizes = [2, 32], strides = [1, 1]} : vector<2x128xf32> to vector<2x32xf32>
    %86 = vector.extract_strided_slice %83 {offsets = [0, 64], sizes = [2, 32], strides = [1, 1]} : vector<2x128xf32> to vector<2x32xf32>
    %87 = vector.extract_strided_slice %83 {offsets = [0, 96], sizes = [2, 32], strides = [1, 1]} : vector<2x128xf32> to vector<2x32xf32>
    %88 = arith.mulf %85, %71 : vector<2x32xf32>
    %89 = arith.mulf %84, %86 : vector<2x32xf32>
    %90 = arith.addf %88, %89 : vector<2x32xf32>
    %91 = math.tanh %90 : vector<2x32xf32>
    %92 = arith.mulf %87, %91 : vector<2x32xf32>
    %93 = vector.extract_strided_slice %26 {offsets = [6, 0], sizes = [2, 128], strides = [1, 1]} : vector<16x128xf32> to vector<2x128xf32>
    %cst_23 = arith.constant dense<0.000000e+00> : vector<2x128xf32>
    %94 = tpu.matmul %92, %27, %cst_23 {dimension_numbers = #tpu.dot_dimension_numbers<[1], [0], [0], [1], [0, 0, 1, 1], [], []>} : vector<2x32xf32>, vector<32x128xf32>, vector<2x128xf32> -> vector<2x128xf32>
    %95 = arith.addf %93, %94 : vector<2x128xf32>
    %96 = math.tanh %95 : vector<2x128xf32>
    %97 = arith.negf %95 : vector<2x128xf32>
    %98 = math.exp %97 : vector<2x128xf32>
    %cst_24 = arith.constant 1.000000e+00 : f32
    %99 = vector.broadcast %cst_24 : f32 to vector<2x128xf32>
    %100 = arith.addf %99, %98 : vector<2x128xf32>
    %101 = arith.divf %99, %100 : vector<2x128xf32>
    %102 = arith.select %33, %96, %101 : vector<2x128xi1>, vector<2x128xf32>
    %103 = vector.extract_strided_slice %102 {offsets = [0, 0], sizes = [2, 32], strides = [1, 1]} : vector<2x128xf32> to vector<2x32xf32>
    %104 = vector.extract_strided_slice %102 {offsets = [0, 32], sizes = [2, 32], strides = [1, 1]} : vector<2x128xf32> to vector<2x32xf32>
    %105 = vector.extract_strided_slice %102 {offsets = [0, 64], sizes = [2, 32], strides = [1, 1]} : vector<2x128xf32> to vector<2x32xf32>
    %106 = vector.extract_strided_slice %102 {offsets = [0, 96], sizes = [2, 32], strides = [1, 1]} : vector<2x128xf32> to vector<2x32xf32>
    %107 = arith.mulf %104, %90 : vector<2x32xf32>
    %108 = arith.mulf %103, %105 : vector<2x32xf32>
    %109 = arith.addf %107, %108 : vector<2x32xf32>
    %110 = math.tanh %109 : vector<2x32xf32>
    %111 = arith.mulf %106, %110 : vector<2x32xf32>
    %112 = vector.extract_strided_slice %26 {offsets = [8, 0], sizes = [2, 128], strides = [1, 1]} : vector<16x128xf32> to vector<2x128xf32>
    %cst_25 = arith.constant dense<0.000000e+00> : vector<2x128xf32>
    %113 = tpu.matmul %111, %27, %cst_25 {dimension_numbers = #tpu.dot_dimension_numbers<[1], [0], [0], [1], [0, 0, 1, 1], [], []>} : vector<2x32xf32>, vector<32x128xf32>, vector<2x128xf32> -> vector<2x128xf32>
    %114 = arith.addf %112, %113 : vector<2x128xf32>
    %115 = math.tanh %114 : vector<2x128xf32>
    %116 = arith.negf %114 : vector<2x128xf32>
    %117 = math.exp %116 : vector<2x128xf32>
    %cst_26 = arith.constant 1.000000e+00 : f32
    %118 = vector.broadcast %cst_26 : f32 to vector<2x128xf32>
    %119 = arith.addf %118, %117 : vector<2x128xf32>
    %120 = arith.divf %118, %119 : vector<2x128xf32>
    %121 = arith.select %33, %115, %120 : vector<2x128xi1>, vector<2x128xf32>
    %122 = vector.extract_strided_slice %121 {offsets = [0, 0], sizes = [2, 32], strides = [1, 1]} : vector<2x128xf32> to vector<2x32xf32>
    %123 = vector.extract_strided_slice %121 {offsets = [0, 32], sizes = [2, 32], strides = [1, 1]} : vector<2x128xf32> to vector<2x32xf32>
    %124 = vector.extract_strided_slice %121 {offsets = [0, 64], sizes = [2, 32], strides = [1, 1]} : vector<2x128xf32> to vector<2x32xf32>
    %125 = vector.extract_strided_slice %121 {offsets = [0, 96], sizes = [2, 32], strides = [1, 1]} : vector<2x128xf32> to vector<2x32xf32>
    %126 = arith.mulf %123, %109 : vector<2x32xf32>
    %127 = arith.mulf %122, %124 : vector<2x32xf32>
    %128 = arith.addf %126, %127 : vector<2x32xf32>
    %129 = math.tanh %128 : vector<2x32xf32>
    %130 = arith.mulf %125, %129 : vector<2x32xf32>
    %131 = vector.extract_strided_slice %26 {offsets = [10, 0], sizes = [2, 128], strides = [1, 1]} : vector<16x128xf32> to vector<2x128xf32>
    %cst_27 = arith.constant dense<0.000000e+00> : vector<2x128xf32>
    %132 = tpu.matmul %130, %27, %cst_27 {dimension_numbers = #tpu.dot_dimension_numbers<[1], [0], [0], [1], [0, 0, 1, 1], [], []>} : vector<2x32xf32>, vector<32x128xf32>, vector<2x128xf32> -> vector<2x128xf32>
    %133 = arith.addf %131, %132 : vector<2x128xf32>
    %134 = math.tanh %133 : vector<2x128xf32>
    %135 = arith.negf %133 : vector<2x128xf32>
    %136 = math.exp %135 : vector<2x128xf32>
    %cst_28 = arith.constant 1.000000e+00 : f32
    %137 = vector.broadcast %cst_28 : f32 to vector<2x128xf32>
    %138 = arith.addf %137, %136 : vector<2x128xf32>
    %139 = arith.divf %137, %138 : vector<2x128xf32>
    %140 = arith.select %33, %134, %139 : vector<2x128xi1>, vector<2x128xf32>
    %141 = vector.extract_strided_slice %140 {offsets = [0, 0], sizes = [2, 32], strides = [1, 1]} : vector<2x128xf32> to vector<2x32xf32>
    %142 = vector.extract_strided_slice %140 {offsets = [0, 32], sizes = [2, 32], strides = [1, 1]} : vector<2x128xf32> to vector<2x32xf32>
    %143 = vector.extract_strided_slice %140 {offsets = [0, 64], sizes = [2, 32], strides = [1, 1]} : vector<2x128xf32> to vector<2x32xf32>
    %144 = vector.extract_strided_slice %140 {offsets = [0, 96], sizes = [2, 32], strides = [1, 1]} : vector<2x128xf32> to vector<2x32xf32>
    %145 = arith.mulf %142, %128 : vector<2x32xf32>
    %146 = arith.mulf %141, %143 : vector<2x32xf32>
    %147 = arith.addf %145, %146 : vector<2x32xf32>
    %148 = math.tanh %147 : vector<2x32xf32>
    %149 = arith.mulf %144, %148 : vector<2x32xf32>
    %150 = vector.extract_strided_slice %26 {offsets = [12, 0], sizes = [2, 128], strides = [1, 1]} : vector<16x128xf32> to vector<2x128xf32>
    %cst_29 = arith.constant dense<0.000000e+00> : vector<2x128xf32>
    %151 = tpu.matmul %149, %27, %cst_29 {dimension_numbers = #tpu.dot_dimension_numbers<[1], [0], [0], [1], [0, 0, 1, 1], [], []>} : vector<2x32xf32>, vector<32x128xf32>, vector<2x128xf32> -> vector<2x128xf32>
    %152 = arith.addf %150, %151 : vector<2x128xf32>
    %153 = math.tanh %152 : vector<2x128xf32>
    %154 = arith.negf %152 : vector<2x128xf32>
    %155 = math.exp %154 : vector<2x128xf32>
    %cst_30 = arith.constant 1.000000e+00 : f32
    %156 = vector.broadcast %cst_30 : f32 to vector<2x128xf32>
    %157 = arith.addf %156, %155 : vector<2x128xf32>
    %158 = arith.divf %156, %157 : vector<2x128xf32>
    %159 = arith.select %33, %153, %158 : vector<2x128xi1>, vector<2x128xf32>
    %160 = vector.extract_strided_slice %159 {offsets = [0, 0], sizes = [2, 32], strides = [1, 1]} : vector<2x128xf32> to vector<2x32xf32>
    %161 = vector.extract_strided_slice %159 {offsets = [0, 32], sizes = [2, 32], strides = [1, 1]} : vector<2x128xf32> to vector<2x32xf32>
    %162 = vector.extract_strided_slice %159 {offsets = [0, 64], sizes = [2, 32], strides = [1, 1]} : vector<2x128xf32> to vector<2x32xf32>
    %163 = vector.extract_strided_slice %159 {offsets = [0, 96], sizes = [2, 32], strides = [1, 1]} : vector<2x128xf32> to vector<2x32xf32>
    %164 = arith.mulf %161, %147 : vector<2x32xf32>
    %165 = arith.mulf %160, %162 : vector<2x32xf32>
    %166 = arith.addf %164, %165 : vector<2x32xf32>
    %167 = math.tanh %166 : vector<2x32xf32>
    %168 = arith.mulf %163, %167 : vector<2x32xf32>
    %169 = vector.extract_strided_slice %26 {offsets = [14, 0], sizes = [2, 128], strides = [1, 1]} : vector<16x128xf32> to vector<2x128xf32>
    %cst_31 = arith.constant dense<0.000000e+00> : vector<2x128xf32>
    %170 = tpu.matmul %168, %27, %cst_31 {dimension_numbers = #tpu.dot_dimension_numbers<[1], [0], [0], [1], [0, 0, 1, 1], [], []>} : vector<2x32xf32>, vector<32x128xf32>, vector<2x128xf32> -> vector<2x128xf32>
    %171 = arith.addf %169, %170 : vector<2x128xf32>
    %172 = math.tanh %171 : vector<2x128xf32>
    %173 = arith.negf %171 : vector<2x128xf32>
    %174 = math.exp %173 : vector<2x128xf32>
    %cst_32 = arith.constant 1.000000e+00 : f32
    %175 = vector.broadcast %cst_32 : f32 to vector<2x128xf32>
    %176 = arith.addf %175, %174 : vector<2x128xf32>
    %177 = arith.divf %175, %176 : vector<2x128xf32>
    %178 = arith.select %33, %172, %177 : vector<2x128xi1>, vector<2x128xf32>
    %179 = vector.extract_strided_slice %178 {offsets = [0, 0], sizes = [2, 32], strides = [1, 1]} : vector<2x128xf32> to vector<2x32xf32>
    %180 = vector.extract_strided_slice %178 {offsets = [0, 32], sizes = [2, 32], strides = [1, 1]} : vector<2x128xf32> to vector<2x32xf32>
    %181 = vector.extract_strided_slice %178 {offsets = [0, 64], sizes = [2, 32], strides = [1, 1]} : vector<2x128xf32> to vector<2x32xf32>
    %182 = vector.extract_strided_slice %178 {offsets = [0, 96], sizes = [2, 32], strides = [1, 1]} : vector<2x128xf32> to vector<2x32xf32>
    %183 = arith.mulf %180, %166 : vector<2x32xf32>
    %184 = arith.mulf %179, %181 : vector<2x32xf32>
    %185 = arith.addf %183, %184 : vector<2x32xf32>
    %186 = math.tanh %185 : vector<2x32xf32>
    %187 = arith.mulf %182, %186 : vector<2x32xf32>
    %c176 = arith.constant 176 : index
    %c0_33 = arith.constant 0 : index
    %188 = vector.load %arg0[%c176, %c0_33] : memref<360x128xf32, #tpu.memory_space<vmem>>, vector<32x64xf32>
    %cst_34 = arith.constant dense<0.000000e+00> : vector<2x64xf32>
    %189 = tpu.matmul %14, %188, %cst_34 {dimension_numbers = #tpu.dot_dimension_numbers<[1], [0], [0], [1], [0, 0, 1, 1], [], []>} : vector<2x32xf32>, vector<32x64xf32>, vector<2x64xf32> -> vector<2x64xf32>
    %c208 = arith.constant 208 : index
    %c0_35 = arith.constant 0 : index
    %190 = vector.load %arg0[%c208, %c0_35] : memref<360x128xf32, #tpu.memory_space<vmem>>, vector<32x64xf32>
    %cst_36 = arith.constant dense<0.000000e+00> : vector<2x64xf32>
    %191 = tpu.matmul %187, %190, %cst_36 {dimension_numbers = #tpu.dot_dimension_numbers<[1], [0], [0], [1], [0, 0, 1, 1], [], []>} : vector<2x32xf32>, vector<32x64xf32>, vector<2x64xf32> -> vector<2x64xf32>
    %192 = arith.addf %189, %191 : vector<2x64xf32>
    %c240 = arith.constant 240 : index
    %c0_37 = arith.constant 0 : index
    %193 = vector.load %arg0[%c240, %c0_37] : memref<360x128xf32, #tpu.memory_space<vmem>>, vector<1x64xf32>
    %194 = vector.broadcast %193 : vector<1x64xf32> to vector<2x64xf32>
    %195 = arith.addf %192, %194 : vector<2x64xf32>
    %cst_38 = arith.constant 0.000000e+00 : f32
    %196 = vector.broadcast %cst_38 : f32 to vector<2x64xf32>
    %197 = arith.maximumf %195, %196 : vector<2x64xf32>
    %c248 = arith.constant 248 : index
    %c0_39 = arith.constant 0 : index
    %198 = vector.load %arg0[%c248, %c0_39] : memref<360x128xf32, #tpu.memory_space<vmem>>, vector<64x32xf32>
    %cst_40 = arith.constant dense<0.000000e+00> : vector<2x32xf32>
    %199 = tpu.matmul %197, %198, %cst_40 {dimension_numbers = #tpu.dot_dimension_numbers<[1], [0], [0], [1], [0, 0, 1, 1], [], []>} : vector<2x64xf32>, vector<64x32xf32>, vector<2x32xf32> -> vector<2x32xf32>
    %c312 = arith.constant 312 : index
    %c0_41 = arith.constant 0 : index
    %200 = vector.load %arg0[%c312, %c0_41] : memref<360x128xf32, #tpu.memory_space<vmem>>, vector<1x32xf32>
    %201 = vector.broadcast %200 : vector<1x32xf32> to vector<2x32xf32>
    %202 = arith.addf %199, %201 : vector<2x32xf32>
    %cst_42 = arith.constant 0.000000e+00 : f32
    %203 = vector.broadcast %cst_42 : f32 to vector<2x32xf32>
    %204 = arith.maximumf %202, %203 : vector<2x32xf32>
    %c320 = arith.constant 320 : index
    %c0_43 = arith.constant 0 : index
    %205 = vector.load %arg0[%c320, %c0_43] : memref<360x128xf32, #tpu.memory_space<vmem>>, vector<32x128xf32>
    %cst_44 = arith.constant dense<0.000000e+00> : vector<2x128xf32>
    %206 = tpu.matmul %204, %205, %cst_44 {dimension_numbers = #tpu.dot_dimension_numbers<[1], [0], [0], [1], [0, 0, 1, 1], [], []>} : vector<2x32xf32>, vector<32x128xf32>, vector<2x128xf32> -> vector<2x128xf32>
    %c352 = arith.constant 352 : index
    %c0_45 = arith.constant 0 : index
    %207 = vector.load %arg0[%c352, %c0_45] : memref<360x128xf32, #tpu.memory_space<vmem>>, vector<1x128xf32>
    %208 = vector.broadcast %207 : vector<1x128xf32> to vector<2x128xf32>
    %209 = arith.addf %206, %208 : vector<2x128xf32>
    %cst_46 = arith.constant 0.000000e+00 : f32
    %210 = vector.broadcast %cst_46 : f32 to vector<2x64xf32>
    %211 = tpu.concatenate %187, %185, %210 in 1 : vector<2x32xf32>, vector<2x32xf32>, vector<2x64xf32> -> vector<2x128xf32>
    %212 = tpu.concatenate %209, %211 in 0 : vector<2x128xf32>, vector<2x128xf32> -> vector<4x128xf32>
    %c0_47 = arith.constant 0 : index
    %c0_48 = arith.constant 0 : index
    %213 = vector.load %arg3[%c0_47, %c0_48] : memref<4x128xf32, #tpu.memory_space<vmem>>, vector<4x128xf32>
    tpu.vector_store %arg3[%c0_47, %c0_48], %212 {strides = array<i32>} : memref<4x128xf32, #tpu.memory_space<vmem>>, vector<4x128xf32>,
    return
  }
}

</mosaic_0001>

<bundles_post_ra>
// kernel: comp_fcnn_tar_rnn_forward.1
= control target key start
LH: loop header
LB: loop body
LE: loop exit
PB: predicated region body
PF: predicated region fallthrough
CT: control target
= control target key end

     0   :  { %8 = vsyncpa [#allocation3], 0  ;;  %s2004_s12 = smov [#allocation2]   ;;  %s2230_s0 = inlined_call_operand.hbm [shape: f32[360,128], index: 0, kind: input, shape index: {}]   ;;  %s2231_s1 = inlined_call_operand.vmem [shape: f32[2,32], index: 1, kind: input, shape index: {}]   ;;  %s2232_s2 = inlined_call_operand.vmem [shape: s32[16,1], index: 2, kind: input, shape index: {}]   ;;  %s2233_s3 = inlined_call_operand.vmem [shape: f32[4,128], index: 3, kind: output, shape index: {}]  }
   0x1   :  { %s14_s13 = sshll.u32 %s2004_s12, 4  ;;  %s1980_s16 = scalar_lea.hbm %s2230_s0, 5760  ;;  %s15_s13 = int_to_ptr.vmem [resolvable:$true] %s14_s13 }
   0x2   :  { %p1981_p0 = scmp.ne.s32.totalorder %s2230_s0, %s1980_s16  ;;  %p1984_p1 = scmp.lt.u32.totalorder %s1980_s16, %s2230_s0 }
   0x4   :  { %p1986_p2 = pnand %p1984_p1, %p1981_p0 }
   0x6   :  { %1989 = shalt.err (!%p1986_p2)
}
   0x7   :  { %s1990_s21 = scalar_lea.vmem %s15_s13, 5760  ;;  %p1995_p4 = scmp.lt.s32.totalorder %s15_s13, %s15_s13 }
   0x8   :  { %p1991_p3 = scmp.ne.s32.totalorder %s15_s13, %s1990_s21  ;;  %p1996_p5 = scmp.lt.s32.totalorder %s1990_s21, %s1990_s21 }
   0xa   :  { %p1997_p6 = por %p1996_p5, %p1995_p4 }
   0xc   :  { %p1998_p7 = pnand %p1997_p6, %p1991_p3 }
   0xe   :  { %2001 = shalt.err (!%p1998_p7)
}
   0xf   :  { %s2005_s22 = smov 128   ;;  %s2006_s23 = smov 8  }
  0x10   :  { %20 = dma.hbm_to_vmem [thread:$0]  %s2230_s0, 5760, %s15_s13, [#allocation3], %s2005_s22, %s2005_s22, %s2006_s23  }
  0x11   :  { %2002 = dma.done.wait [#allocation3], 5760  }
  0x12   :  { %2003 = vsyncadd [#allocation3], 4294961536  ;;  %v2007_v0 = vmov 0   ;;  %v2008_v1 = vmov 0.0|0.0   ;;  %vm2009_vm0 = vmmov 0   ;;  %v2010_v2 = vmov 0.0  }
  0x13   :  { %1915 = vset.pattern.permute.xlu0 %v2007_v0  ;;  %1806 = vmatprep.subr.bf16.mxu0 %v2008_v1  ;;  %v201_v3 = vld [vmem:[%s2232_s2] sm:$0xff]  ;;  %v30_v5 = vld [vmem:[#allocation2 + $0x8] sm:$0xff]  ;;  %v31_v6 = vld [vmem:[#allocation2 + $0x10] sm:$0xff]  ;;  %vm38_vm1 = vcmask 261120   ;;  %v203_v28 = vlaneseq  ;;  %vm225_vm2 = vcmask 195584   ;;  %vm126_vm5 = vcmask 523264  }
  0x14   :  { %1635 = vmatprep.mubr.msk.f32.mxu0 %vm2009_vm0, %v2010_v2  ;;  %1812 = vmatprep.subr.bf16.mxu1 %v2008_v1  ;;  %v29_v4 = vld [vmem:[#allocation2] sm:$0xff]  ;;  %v32_v7 = vld [vmem:[#allocation2 + $0x18] sm:$0xff]  ;;  %v202_v8 = vld [vmem:[%s2232_s2 + $0x8] sm:$0xff]  ;;  %s2012_s2 = smov 32   ;;  %vm1505_vm9 = vcmask 1041408  }
  0x15   :  { %1654 = vmatprep.mubr.msk.f32.mxu1 %vm2009_vm0, %v2010_v2  ;;  %206 = vperm.xlu0 %1915, %v201_v3   ;;  %v1807_v9 = vpack.c.bf16 %v30_v5, %v29_v4  ;;  %v217_v10 = vld [vmem:[#allocation2 + $0x70] sm:$0xff]  ;;  %v218_v11 = vld [vmem:[#allocation2 + $0x78] sm:$0xff]  ;;  %v1810_v12 = vpack.c.bf16 %v32_v7, %v31_v6  ;;  %v28_v14 = vld [vmem:[%s2231_s1] sm:$0x3]  ;;  %v204_v29 = vand.u32 127, %v203_v28  ;;  %s2011_s1 = smov 64  }
  0x16   :  { %v1824_v13 = vpack.c.bf16 %v218_v11, %v217_v10  ;;  %v219_v15 = vld [vmem:[#allocation2 + $0x80] sm:$0xff]  ;;  %v113_v16 = vld [vmem:[#allocation2 + $0x28] sm:$0xff]  ;;  %v114_v17 = vld [vmem:[#allocation2 + $0x30] sm:$0xff] }
  0x17   :  { %1808 = vmatpush3.bf16.msra.mxu0 %v1807_v9  ;;  %v115_v18 = vld [vmem:[#allocation2 + $0x38] sm:$0xff]  ;;  %v1813_v19 = vpack.c.bf16 %v114_v17, %v113_v16  ;;  %v116_v20 = vld [vmem:[#allocation2 + $0x40] sm:$0xff]  ;;  %v117_v22 = vld [vmem:[#allocation2 + $0x48] sm:$0xff]  ;;  %vm311_vm6 = vcmp.ge.s32.totalorder %v204_v29, 64  ;;  %vm312_vm7 = vcmp.lt.s32.totalorder %v204_v29, 96 }
  0x18   :  { %1809 = vmatprep.subr.bf16.mxu0 %v2008_v1  ;;  %v1816_v21 = vpack.c.bf16 %v116_v20, %v115_v18  ;;  %v118_v23 = vld [vmem:[#allocation2 + $0x50] sm:$0xff]  ;;  %v119_v25 = vld [vmem:[#allocation2 + $0x58] sm:$0xff]  ;;  %v120_v26 = vld [vmem:[#allocation2 + $0x60] sm:$0xff] }
  0x19   :  { %209 = vperm.xlu0 %1915, %v202_v8   ;;  %1814 = vmatpush3.bf16.msra.mxu1 %v1813_v19  ;;  %v1819_v24 = vpack.c.bf16 %v118_v23, %v117_v22  ;;  %v1822_v27 = vpack.c.bf16 %v120_v26, %v119_v25  ;;  %v307_v31 = vld [vmem:[#allocation2 + $0x90] sm:$0xff]  ;;  %v308_v32 = vld [vmem:[#allocation2 + $0x98] sm:$0xff]  ;;  %v309_v36 = vld [vmem:[#allocation2 + $0xa0] sm:$0xff] }
  0x1a   :  { %1815 = vmatprep.subr.bf16.mxu1 %v2008_v1  ;;  %v2068_v35 = vpack.c.bf16 %v308_v32, %v307_v31  ;;  %v310_v37 = vld [vmem:[#allocation2 + $0xa8] sm:$0xff]  ;;  %v1513_v40 = vld [vmem:[#allocation2 + $0x20] ss:$0 sm:$0xff]  ;;  %vm2098_vm8 = vmand %vm311_vm6, %vm312_vm7 }
  0x1b   :  { %1811 = vmatpush3.bf16.msra.mxu0 %v1810_v12  ;;  %v2072_v39 = vpack.c.bf16 %v310_v37, %v309_v36  ;;  %v1519_v45 = vld [vmem:[#allocation2 + $0x88] ss:$0 sm:$0xff] }
  0x1c   :  { %1825 = vmatprep.subr.bf16.mxu0 %v1824_v13 }
  0x1d   :  { %1817 = vmatpush3.bf16.msra.mxu1 %v1816_v21 }
  0x1e   :  { %1636 = vmatmul.mubr.msk.f32.vlgmr.msra.gmra.mrb[0].mxu0 %vm38_vm1, %v28_v14  ;;  %1818 = vmatprep.subr.bf16.mxu1 %v2008_v1 }
  0x1f   :  { %1827 = vmatpush3.bf16.msra.mxu0 %v1824_v13 }
  0x20   :  { %1661 = vmatprep.subr.mxu0 %v219_v15 }
  0x21   :  { %1820 = vmatpush3.bf16.msra.mxu1 %v1819_v24 }
  0x22   :  { %1821 = vmatprep.subr.bf16.mxu1 %v2008_v1 }
  0x23   :  { %1662 = vmatpush3.msra.mxu0 %v219_v15 }
  0x24   :  { %1828 = vmatprep.subr.bf16.mxu0 %v2008_v1 }
  0x25   :  { %1823 = vmatpush3.bf16.msra.mxu1 %v1822_v27 }
  0x26   :  { %1834 = vmatprep.subr.bf16.mxu1 %v2008_v1 }
  0x94   :  { %v207_v30 = vpop.permute.xlu0 %206 }
  0x95   :  { %vm211_vm3 = vcmp.eq.s32.totalorder %v207_v30, %v204_v29 }
  0x96   :  { %v1517_v33 = vsel %vm211_vm3, 1.0, %v2010_v2 }
  0x97   :  { %1663 = vmatprep.mubr.msk.f32.mxu0 %vm225_vm2, %v1517_v33 }
  0x98   :  { %v210_v34 = vpop.permute.xlu0 %209 }
  0x99   :  { %vm212_vm4 = vcmp.eq.s32.totalorder %v210_v34, %v204_v29 }
  0x9a   :  { %v1518_v38 = vsel %vm212_vm4, 1.0, %v2010_v2 }
  0x9b   :  { %1664 = vmatmul.mubr.msk.f32.vlgmr.msra.gmra.mrb[2].mxu0 %vm225_vm2, %v1518_v38 }
  0x9c   :  { %1830 = vmatpush3.bf16.msra.mxu0 %v2068_v35  ;;  %1674 = vmatprep.mubr.msk.f32.mxu0 %vm2009_vm0, %v2010_v2 }
  0x9d   :  { %1831 = vmatprep.subr.bf16.mxu0 %v2008_v1 }
  0xa0   :  { %1833 = vmatpush3.bf16.msra.mxu0 %v2072_v39 }
  0xa1   :  { %1840 = vmatprep.subr.bf16.mxu0 %v2008_v1 }
  0xa3   :  { %1675 = vmatmul.mubr.f32.vlgmr.msra.gmra.mrb[4].mxu0 %v2010_v2 }
  0xa4   :  { %1842 = vmatpush3.bf16.msra.mxu0 %v2068_v35  ;;  %1696 = vmatprep.mubr.msk.f32.mxu0 %vm2009_vm0, %v2010_v2 }
  0xa5   :  { %1843 = vmatprep.subr.bf16.mxu0 %v2008_v1 }
  0xa8   :  { %1845 = vmatpush3.bf16.msra.mxu0 %v2072_v39 }
  0xa9   :  { %1852 = vmatprep.subr.bf16.mxu0 %v2008_v1 }
  0xf1   :  { %v108_v41 = vpop.f32.mrb[0].mxu0 }
  0xf2   :  { %v109_v42 = vadd.f32 %v1513_v40, %v108_v41  ;;  %v1637_v43 = vpop.f32.mrb[1].mxu0 }
  0xf4   :  { %v112_v44 = vmax.f32 %v109_v42, 0.0 }
  0xf6   :  { %1655 = vmatmul.mubr.msk.f32.vlgmr.msra.gmra.mrb[0].mxu1 %vm126_vm5, %v112_v44 }
  0xf7   :  { %1836 = vmatpush3.bf16.msra.mxu1 %v2068_v35  ;;  %1685 = vmatprep.mubr.msk.f32.mxu1 %vm2009_vm0, %v2010_v2 }
  0xf8   :  { %1837 = vmatprep.subr.bf16.mxu1 %v2008_v1 }
  0xfb   :  { %1839 = vmatpush3.bf16.msra.mxu1 %v2072_v39 }
  0xfc   :  { %1846 = vmatprep.subr.bf16.mxu1 %v2008_v1 }
 0x16e   :  { %v1665_v46 = vpop.f32.mrb[2].mxu0 }
 0x16f   :  { %v2093_v47 = vadd.f32 %v1665_v46, %v1519_v45  ;;  %v298_v48 = vpop.f32.mrb[3].mxu0 }
 0x170   :  { %v2095_v49 = vadd.f32 %v1519_v45, %v298_v48 }
 0x176   :  { %v383_v50 = vpop.f32.mrb[4].mxu0 }
 0x177   :  { %v387_v51 = vadd.f32 %v383_v50, %v2095_v49  ;;  %v1676_v52 = vpop.f32.mrb[5].mxu0 }
 0x179   :  { %v1522_v53 = vmul.f32 -1.442695, %v387_v51 }
 0x17b   :  { %1916 = vpow2.f32 %v1522_v53 }
 0x17c   :  { %1918 = vtanh.f32 %v387_v51 }
 0x185   :  { %v1917_v54 = vpop.eup %1916 }
 0x186   :  { %v392_v55 = vadd.f32 1.0, %v1917_v54  ;;  %v1919_v57 = vpop.eup %1918 }
 0x188   :  { %1920 = vrcp.f32 %v392_v55 }
 0x192   :  { %v1921_v58 = vpop.eup %1920 }
 0x193   :  { %v395_v59 = vsel %vm2098_vm8, %v1919_v57, %v1921_v58 }
 0x194   :  { %398 = vrot.lane.b32.xlu1 %v395_v59, %s2011_s1  ;;  %v396_v0 = vmul.f32 0.0, %v395_v59 }
 0x1c9   :  { %v2105_v60 = vpop.f32.mrb[0].mxu1 }
 0x1ca   :  { %v1656_v61 = vpop.f32.mrb[1].mxu1 }
 0x206   :  { %v399_v62 = vpop.permute.xlu1 %398 }
 0x207   :  { %v401_v63 = vmul.f32 %v399_v62, %v395_v59 }
 0x209   :  { %403 = vrot.lane.b32.xlu1 %v401_v63, %s2012_s2 }
 0x27b   :  { %v404_v3 = vpop.permute.xlu1 %403 }
 0x27c   :  { %v406_v4 = vadd.f32 %v404_v3, %v396_v0 }
 0x27e   :  { %1922 = vtanh.f32 %v406_v4  ;;  %v501_v21 = vrot.slane %v406_v4, 6 }
 0x288   :  { %v1923_v5 = vpop.eup %1922 }
 0x289   :  { %409 = vrot.lane.b32.xlu0 %v1923_v5, %s2011_s1 }
 0x2fb   :  { %v410_v6 = vpop.permute.xlu0 %409 }
 0x2fc   :  { %v412_v7 = vmul.f32 %v410_v6, %v395_v59 }
 0x2fe   :  { %414 = vrot.lane.b32.xlu1 %v412_v7, %s2012_s2 }
 0x370   :  { %v415_v8 = vpop.permute.xlu1 %414 }
 0x371   :  { %1686 = vmatmul.mubr.msk.f32.vlgmr.msra.gmra.mrb[2].mxu1 %vm38_vm1, %v415_v8 }
 0x372   :  { %1848 = vmatpush3.bf16.msra.mxu1 %v2068_v35  ;;  %1707 = vmatprep.mubr.msk.f32.mxu1 %vm2009_vm0, %v2010_v2 }
 0x373   :  { %1849 = vmatprep.subr.bf16.mxu1 %v2008_v1 }
 0x376   :  { %1851 = vmatpush3.bf16.msra.mxu1 %v2072_v39 }
 0x377   :  { %1858 = vmatprep.subr.bf16.mxu1 %v2008_v1 }
 0x444   :  { %v484_v9 = vpop.f32.mrb[2].mxu1 }
 0x445   :  { %v489_v10 = vrot.slane %v484_v9, 6  ;;  %v1687_v11 = vpop.f32.mrb[3].mxu1 }
 0x447   :  { %v491_v12 = vadd.f32 %v489_v10, %v2095_v49 }
 0x449   :  { %v1524_v13 = vmul.f32 -1.442695, %v491_v12 }
 0x44b   :  { %1924 = vpow2.f32 %v1524_v13 }
 0x44c   :  { %1926 = vtanh.f32 %v491_v12 }
 0x455   :  { %v1925_v14 = vpop.eup %1924 }
 0x456   :  { %v496_v15 = vadd.f32 1.0, %v1925_v14  ;;  %v1927_v16 = vpop.eup %1926 }
 0x458   :  { %1928 = vrcp.f32 %v496_v15 }
 0x462   :  { %v1929_v17 = vpop.eup %1928 }
 0x463   :  { %v499_v18 = vsel %vm2098_vm8, %v1927_v16, %v1929_v17 }
 0x464   :  { %505 = vrot.lane.b32.xlu0 %v499_v18, %s2011_s1  ;;  %v503_v22 = vmul.f32 %v501_v21, %v499_v18 }
 0x4d6   :  { %v506_v19 = vpop.permute.xlu0 %505 }
 0x4d7   :  { %v508_v20 = vmul.f32 %v506_v19, %v499_v18 }
 0x4d9   :  { %510 = vrot.lane.b32.xlu1 %v508_v20, %s2012_s2 }
 0x54b   :  { %v511_v23 = vpop.permute.xlu1 %510 }
 0x54c   :  { %v513_v24 = vadd.f32 %v511_v23, %v503_v22 }
 0x54e   :  { %1930 = vtanh.f32 %v513_v24  ;;  %v609_v44 = vrot.slane %v513_v24, 6 }
 0x558   :  { %v1931_v25 = vpop.eup %1930 }
 0x559   :  { %516 = vrot.lane.b32.xlu0 %v1931_v25, %s2011_s1 }
 0x5cb   :  { %v517_v26 = vpop.permute.xlu0 %516 }
 0x5cc   :  { %v519_v27 = vmul.f32 %v517_v26, %v499_v18 }
 0x5ce   :  { %v521_v28 = vrot.slane %v519_v27, 2 }
 0x5d0   :  { %522 = vrot.lane.b32.xlu1 %v521_v28, %s2012_s2 }
 0x642   :  { %v523_v29 = vpop.permute.xlu1 %522 }
 0x643   :  { %1697 = vmatmul.mubr.msk.f32.vlgmr.msra.gmra.mrb[6].mxu0 %vm38_vm1, %v523_v29 }
 0x644   :  { %1854 = vmatpush3.bf16.msra.mxu0 %v2068_v35  ;;  %1718 = vmatprep.mubr.msk.f32.mxu0 %vm2009_vm0, %v2010_v2 }
 0x645   :  { %1855 = vmatprep.subr.bf16.mxu0 %v2008_v1 }
 0x648   :  { %1857 = vmatpush3.bf16.msra.mxu0 %v2072_v39 }
 0x649   :  { %1864 = vmatprep.subr.bf16.mxu0 %v2008_v1 }
 0x716   :  { %v592_v30 = vpop.f32.mrb[6].mxu0 }
 0x717   :  { %v597_v31 = vrot.slane %v592_v30, 4  ;;  %v1698_v32 = vpop.f32.mrb[7].mxu0 }
 0x719   :  { %v599_v33 = vadd.f32 %v597_v31, %v2095_v49 }
 0x71b   :  { %v1526_v34 = vmul.f32 -1.442695, %v599_v33 }
 0x71d   :  { %1932 = vpow2.f32 %v1526_v34 }
 0x71e   :  { %1934 = vtanh.f32 %v599_v33 }
 0x727   :  { %v1933_v36 = vpop.eup %1932 }
 0x728   :  { %v604_v37 = vadd.f32 1.0, %v1933_v36  ;;  %v1935_v38 = vpop.eup %1934 }
 0x72a   :  { %1936 = vrcp.f32 %v604_v37 }
 0x734   :  { %v1937_v40 = vpop.eup %1936 }
 0x735   :  { %v607_v41 = vsel %vm2098_vm8, %v1935_v38, %v1937_v40 }
 0x736   :  { %613 = vrot.lane.b32.xlu0 %v607_v41, %s2011_s1  ;;  %v611_v45 = vmul.f32 %v609_v44, %v607_v41 }
 0x7a8   :  { %v614_v42 = vpop.permute.xlu0 %613 }
 0x7a9   :  { %v616_v43 = vmul.f32 %v614_v42, %v607_v41 }
 0x7ab   :  { %618 = vrot.lane.b32.xlu1 %v616_v43, %s2012_s2 }
 0x81d   :  { %v619_v46 = vpop.permute.xlu1 %618 }
 0x81e   :  { %v621_v48 = vadd.f32 %v619_v46, %v611_v45 }
 0x820   :  { %1938 = vtanh.f32 %v621_v48  ;;  %v717_v7 = vrot.slane %v621_v48, 6 }
 0x82a   :  { %v1939_v50 = vpop.eup %1938 }
 0x82b   :  { %624 = vrot.lane.b32.xlu0 %v1939_v50, %s2011_s1 }
 0x89d   :  { %v625_v51 = vpop.permute.xlu0 %624 }
 0x89e   :  { %v627_v52 = vmul.f32 %v625_v51, %v607_v41 }
 0x8a0   :  { %v629_v53 = vrot.slane %v627_v52, 4 }
 0x8a2   :  { %630 = vrot.lane.b32.xlu1 %v629_v53, %s2012_s2 }
 0x914   :  { %v631_v54 = vpop.permute.xlu1 %630 }
 0x915   :  { %1708 = vmatmul.mubr.msk.f32.vlgmr.msra.gmra.mrb[4].mxu1 %vm38_vm1, %v631_v54 }
 0x916   :  { %1860 = vmatpush3.bf16.msra.mxu1 %v2068_v35  ;;  %1729 = vmatprep.mubr.msk.f32.mxu1 %vm2009_vm0, %v2010_v2 }
 0x917   :  { %1861 = vmatprep.subr.bf16.mxu1 %v2008_v1 }
 0x91a   :  { %1863 = vmatpush3.bf16.msra.mxu1 %v2072_v39 }
 0x91b   :  { %1870 = vmatprep.subr.bf16.mxu1 %v2008_v1 }
 0x9e8   :  { %v700_v55 = vpop.f32.mrb[4].mxu1 }
 0x9e9   :  { %v705_v57 = vrot.slane %v700_v55, 2  ;;  %v1709_v58 = vpop.f32.mrb[5].mxu1 }
 0x9eb   :  { %v707_v59 = vadd.f32 %v705_v57, %v2095_v49 }
 0x9ed   :  { %v1528_v61 = vmul.f32 -1.442695, %v707_v59 }
 0x9ef   :  { %1940 = vpow2.f32 %v1528_v61 }
 0x9f0   :  { %1942 = vtanh.f32 %v707_v59 }
 0x9f9   :  { %v1941_v62 = vpop.eup %1940 }
 0x9fa   :  { %v712_v63 = vadd.f32 1.0, %v1941_v62  ;;  %v1943_v0 = vpop.eup %1942 }
 0x9fc   :  { %1944 = vrcp.f32 %v712_v63 }
 0xa06   :  { %v1945_v3 = vpop.eup %1944 }
 0xa07   :  { %v715_v4 = vsel %vm2098_vm8, %v1943_v0, %v1945_v3 }
 0xa08   :  { %721 = vrot.lane.b32.xlu0 %v715_v4, %s2011_s1  ;;  %v719_v8 = vmul.f32 %v717_v7, %v715_v4 }
 0xa7a   :  { %v722_v5 = vpop.permute.xlu0 %721 }
 0xa7b   :  { %v724_v6 = vmul.f32 %v722_v5, %v715_v4 }
 0xa7d   :  { %726 = vrot.lane.b32.xlu1 %v724_v6, %s2012_s2 }
 0xaef   :  { %v727_v49 = vpop.permute.xlu1 %726 }
 0xaf0   :  { %v729_v9 = vadd.f32 %v727_v49, %v719_v8 }
 0xaf2   :  { %1946 = vtanh.f32 %v729_v9  ;;  %v822_v26 = vrot.slane %v729_v9, 6 }
 0xafc   :  { %v1947_v10 = vpop.eup %1946 }
 0xafd   :  { %732 = vrot.lane.b32.xlu0 %v1947_v10, %s2011_s1 }
 0xb6f   :  { %v733_v11 = vpop.permute.xlu0 %732 }
 0xb70   :  { %v735_v12 = vmul.f32 %v733_v11, %v715_v4 }
 0xb72   :  { %v737_v13 = vrot.slane %v735_v12, 6 }
 0xb74   :  { %738 = vrot.lane.b32.xlu1 %v737_v13, %s2012_s2 }
 0xbe6   :  { %v739_v14 = vpop.permute.xlu1 %738 }
 0xbe7   :  { %1719 = vmatmul.mubr.msk.f32.vlgmr.msra.gmra.mrb[8].mxu0 %vm38_vm1, %v739_v14 }
 0xbe8   :  { %1866 = vmatpush3.bf16.msra.mxu0 %v2068_v35  ;;  %1740 = vmatprep.mubr.msk.f32.mxu0 %vm2009_vm0, %v2010_v2 }
 0xbe9   :  { %1867 = vmatprep.subr.bf16.mxu0 %v2008_v1 }
 0xbec   :  { %1869 = vmatpush3.bf16.msra.mxu0 %v2072_v39 }
 0xbed   :  { %1876 = vmatprep.subr.bf16.mxu0 %v2008_v1 }
 0xcba   :  { %v808_v15 = vpop.f32.mrb[8].mxu0 }
 0xcbb   :  { %v812_v16 = vadd.f32 %v808_v15, %v2093_v47  ;;  %v1720_v17 = vpop.f32.mrb[9].mxu0 }
 0xcbc   :  { %v1165_v17 = vld [vmem:[#allocation2 + $0xb8] sm:$0xff] }
 0xcbd   :  { %v1530_v18 = vmul.f32 -1.442695, %v812_v16 }
 0xcbf   :  { %1948 = vpow2.f32 %v1530_v18 }
 0xcc0   :  { %1950 = vtanh.f32 %v812_v16  ;;  %v1164_v16 = vld [vmem:[#allocation2 + $0xb0] sm:$0xff] }
 0xcc1   :  { %v1883_v18 = vpack.c.bf16 %v1165_v17, %v1164_v16  ;;  %v1540_v16 = vld [vmem:[#allocation2 + $0x138] ss:$0 sm:$0xff] }
 0xcc9   :  { %v1949_v19 = vpop.eup %1948 }
 0xcca   :  { %v817_v20 = vadd.f32 1.0, %v1949_v19  ;;  %v1951_v21 = vpop.eup %1950  ;;  %v1166_v19 = vld [vmem:[#allocation2 + $0xc0] sm:$0xff] }
 0xccc   :  { %1952 = vrcp.f32 %v817_v20  ;;  %v1167_v20 = vld [vmem:[#allocation2 + $0xc8] sm:$0xff] }
 0xcd6   :  { %v1953_v22 = vpop.eup %1952 }
 0xcd7   :  { %v820_v23 = vsel %vm2098_vm8, %v1951_v21, %v1953_v22  ;;  %v1515_v21 = vld [vmem:[#allocation2 + $0x68] ss:$0 sm:$0xff] }
 0xcd8   :  { %826 = vrot.lane.b32.xlu0 %v820_v23, %s2011_s1  ;;  %v824_v27 = vmul.f32 %v822_v26, %v820_v23 }
 0xd4a   :  { %v827_v24 = vpop.permute.xlu0 %826 }
 0xd4b   :  { %v829_v25 = vmul.f32 %v827_v24, %v820_v23  ;;  %v197_v24 = vadd.f32 %v1515_v21, %v2105_v60 }
 0xd4d   :  { %831 = vrot.lane.b32.xlu1 %v829_v25, %s2012_s2  ;;  %v200_v25 = vmax.f32 %v197_v24, 0.0 }
 0xdbf   :  { %v832_v28 = vpop.permute.xlu1 %831 }
 0xdc0   :  { %v834_v29 = vadd.f32 %v832_v28, %v824_v27 }
 0xdc2   :  { %1954 = vtanh.f32 %v834_v29  ;;  %v929_v46 = vrot.slane %v834_v29, 6 }
 0xdcc   :  { %v1955_v30 = vpop.eup %1954 }
 0xdcd   :  { %837 = vrot.lane.b32.xlu0 %v1955_v30, %s2011_s1 }
 0xe3f   :  { %v838_v31 = vpop.permute.xlu0 %837 }
 0xe40   :  { %v840_v32 = vmul.f32 %v838_v31, %v820_v23  ;;  %v1886_v23 = vpack.c.bf16 %v1167_v20, %v1166_v19 }
 0xe42   :  { %842 = vrot.lane.b32.xlu1 %v840_v32, %s2012_s2 }
 0xeb4   :  { %v843_v33 = vpop.permute.xlu1 %842 }
 0xeb5   :  { %1730 = vmatmul.mubr.msk.f32.vlgmr.msra.gmra.mrb[6].mxu1 %vm38_vm1, %v843_v33 }
 0xeb6   :  { %1872 = vmatpush3.bf16.msra.mxu1 %v2068_v35  ;;  %1751 = vmatprep.mubr.msk.f32.mxu1 %vm2009_vm0, %v2010_v2 }
 0xeb7   :  { %1873 = vmatprep.subr.bf16.mxu1 %v2008_v1 }
 0xeba   :  { %1875 = vmatpush3.bf16.msra.mxu1 %v2072_v39 }
 0xebb   :  { %1882 = vmatprep.subr.bf16.mxu1 %v2008_v1 }
 0xf88   :  { %v912_v34 = vpop.f32.mrb[6].mxu1 }
 0xf89   :  { %v917_v36 = vrot.slane %v912_v34, 6  ;;  %v1731_v37 = vpop.f32.mrb[7].mxu1 }
 0xf8b   :  { %v919_v38 = vadd.f32 %v917_v36, %v2093_v47 }
 0xf8d   :  { %v1532_v40 = vmul.f32 -1.442695, %v919_v38 }
 0xf8f   :  { %1956 = vpow2.f32 %v1532_v40 }
 0xf90   :  { %1958 = vtanh.f32 %v919_v38 }
 0xf99   :  { %v1957_v41 = vpop.eup %1956 }
 0xf9a   :  { %v924_v42 = vadd.f32 1.0, %v1957_v41  ;;  %v1959_v35 = vpop.eup %1958 }
 0xf9c   :  { %1960 = vrcp.f32 %v924_v42 }
 0xfa6   :  { %v1961_v43 = vpop.eup %1960 }
 0xfa7   :  { %v927_v44 = vsel %vm2098_vm8, %v1959_v35, %v1961_v43  ;;  %v1168_v43 = vld [vmem:[#allocation2 + $0xd0] sm:$0xff] }
 0xfa8   :  { %933 = vrot.lane.b32.xlu0 %v927_v44, %s2011_s1  ;;  %v931_v48 = vmul.f32 %v929_v46, %v927_v44  ;;  %v1171_v46 = vld [vmem:[#allocation2 + $0xe8] sm:$0xff] }
0x101a   :  { %v934_v39 = vpop.permute.xlu0 %933 }
0x101b   :  { %v936_v45 = vmul.f32 %v934_v39, %v927_v44  ;;  %v1170_v39 = vld [vmem:[#allocation2 + $0xe0] sm:$0xff] }
0x101c   :  { %v1880_v56 = vpack.c.bf16 %v1171_v46, %v1170_v39 }
0x101d   :  { %938 = vrot.lane.b32.xlu1 %v936_v45, %s2012_s2 }
0x108f   :  { %v939_v50 = vpop.permute.xlu1 %938 }
0x1090   :  { %v941_v51 = vadd.f32 %v939_v50, %v931_v48 }
0x1092   :  { %1962 = vtanh.f32 %v941_v51  ;;  %v1037_v49 = vrot.slane %v941_v51, 6 }
0x109c   :  { %v1963_v52 = vpop.eup %1962 }
0x109d   :  { %944 = vrot.lane.b32.xlu0 %v1963_v52, %s2011_s1 }
0x110f   :  { %v945_v53 = vpop.permute.xlu0 %944 }
0x1110   :  { %v947_v54 = vmul.f32 %v945_v53, %v927_v44  ;;  %v1169_v44 = vld [vmem:[#allocation2 + $0xd8] sm:$0xff] }
0x1111   :  { %v1877_v45 = vpack.c.bf16 %v1169_v44, %v1168_v43  ;;  %v1328_v53 = vld [vmem:[#allocation2 + $0xf8] sm:$0xff] }
0x1112   :  { %v949_v55 = vrot.slane %v947_v54, 2  ;;  %v1329_v54 = vld [vmem:[#allocation2 + $0x100] sm:$0xff] }
0x1114   :  { %950 = vrot.lane.b32.xlu1 %v949_v55, %s2012_s2  ;;  %v1889_v55 = vpack.c.bf16 %v1329_v54, %v1328_v53 }
0x1186   :  { %v951_v57 = vpop.permute.xlu1 %950 }
0x1187   :  { %1741 = vmatmul.mubr.msk.f32.vlgmr.msra.gmra.mrb[10].mxu0 %vm38_vm1, %v951_v57  ;;  %v1330_v57 = vld [vmem:[#allocation2 + $0x108] sm:$0xff] }
0x1188   :  { %1762 = vmatprep.mubr.msk.f32.mxu0 %vm2009_vm0, %v2010_v2  ;;  %1878 = vmatpush3.bf16.msra.mxu0 %v1877_v45 }
0x1189   :  { %1879 = vmatprep.subr.bf16.mxu0 %v2008_v1 }
0x118c   :  { %1881 = vmatpush3.bf16.msra.mxu0 %v1880_v56 }
0x118d   :  { %1888 = vmatprep.subr.bf16.mxu0 %v2008_v1 }
0x125a   :  { %v1020_v58 = vpop.f32.mrb[10].mxu0 }
0x125b   :  { %v1025_v59 = vrot.slane %v1020_v58, 4  ;;  %v1742_v61 = vpop.f32.mrb[11].mxu0  ;;  %v1331_v58 = vld [vmem:[#allocation2 + $0x110] sm:$0xff] }
0x125c   :  { %v1892_v61 = vpack.c.bf16 %v1331_v58, %v1330_v57 }
0x125d   :  { %v1027_v62 = vadd.f32 %v1025_v59, %v2093_v47 }
0x125f   :  { %v1534_v63 = vmul.f32 -1.442695, %v1027_v62 }
0x1261   :  { %1964 = vpow2.f32 %v1534_v63  ;;  %v1333_v63 = vld [vmem:[#allocation2 + $0x120] sm:$0xff] }
0x1262   :  { %1966 = vtanh.f32 %v1027_v62  ;;  %v1332_v62 = vld [vmem:[#allocation2 + $0x118] sm:$0xff] }
0x126b   :  { %v1965_v0 = vpop.eup %1964 }
0x126c   :  { %v1032_v3 = vadd.f32 1.0, %v1965_v0  ;;  %v1967_v4 = vpop.eup %1966  ;;  %v1895_v0 = vpack.c.bf16 %v1333_v63, %v1332_v62 }
0x126e   :  { %1968 = vrcp.f32 %v1032_v3  ;;  %v1334_v3 = vld [vmem:[#allocation2 + $0x128] sm:$0xff] }
0x1278   :  { %v1969_v5 = vpop.eup %1968 }
0x1279   :  { %v1035_v6 = vsel %vm2098_vm8, %v1967_v4, %v1969_v5  ;;  %v1335_v4 = vld [vmem:[#allocation2 + $0x130] sm:$0xff] }
0x127a   :  { %1041 = vrot.lane.b32.xlu0 %v1035_v6, %s2011_s1  ;;  %v1039_v9 = vmul.f32 %v1037_v49, %v1035_v6  ;;  %v1898_v5 = vpack.c.bf16 %v1335_v4, %v1334_v3  ;;  %v1539_v49 = vld [vmem:[#allocation2 + $0xf0] ss:$0 sm:$0xff] }
0x12ec   :  { %v1042_v7 = vpop.permute.xlu0 %1041 }
0x12ed   :  { %v1044_v8 = vmul.f32 %v1042_v7, %v1035_v6  ;;  %v1416_v7 = vld [vmem:[#allocation2 + $0x148] sm:$0xff] }
0x12ef   :  { %1046 = vrot.lane.b32.xlu1 %v1044_v8, %s2012_s2 }
0x1361   :  { %v1047_v10 = vpop.permute.xlu1 %1046 }
0x1362   :  { %v1049_v11 = vadd.f32 %v1047_v10, %v1039_v9 }
0x1364   :  { %1970 = vtanh.f32 %v1049_v11 }
0x136e   :  { %v1971_v12 = vpop.eup %1970 }
0x136f   :  { %1052 = vrot.lane.b32.xlu0 %v1971_v12, %s2011_s1 }
0x13e1   :  { %v1053_v13 = vpop.permute.xlu0 %1052 }
0x13e2   :  { %v1055_v14 = vmul.f32 %v1053_v13, %v1035_v6  ;;  %v1415_v6 = vld [vmem:[#allocation2 + $0x140] sm:$0xff]  ;;  %v1417_v13 = vld [vmem:[#allocation2 + $0x150] sm:$0xff] }
0x13e3   :  { %v1901_v8 = vpack.c.bf16 %v1416_v7, %v1415_v6 }
0x13e4   :  { %v1057_v15 = vrot.slane %v1055_v14, 4  ;;  %v1418_v14 = vld [vmem:[#allocation2 + $0x158] sm:$0xff] }
0x13e6   :  { %1058 = vrot.lane.b32.xlu1 %v1057_v15, %s2012_s2  ;;  %v1904_v15 = vpack.c.bf16 %v1418_v14, %v1417_v13 }
0x1458   :  { %v1059_v22 = vpop.permute.xlu1 %1058 }
0x1459   :  { %1752 = vmatmul.mubr.msk.f32.vlgmr.msra.gmra.mrb[8].mxu1 %vm38_vm1, %v1059_v22 }
0x145a   :  { %1884 = vmatpush3.bf16.msra.mxu1 %v1883_v18  ;;  %1773 = vmatprep.mubr.msk.f32.mxu1 %vm2009_vm0, %v2010_v2 }
0x145b   :  { %1885 = vmatprep.subr.bf16.mxu1 %v2008_v1 }
0x145e   :  { %1887 = vmatpush3.bf16.msra.mxu1 %v1886_v23  ;;  %v1542_v23 = vld [vmem:[#allocation2 + $0x160] ss:$0 sm:$0xff] }
0x145f   :  { %1900 = vmatprep.subr.bf16.mxu1 %v2008_v1 }
0x1461   :  { %1774 = vmatmul.mubr.msk.f32.vlgmr.msra.gmra.mrb[10].mxu1 %vm38_vm1, %v200_v25 }
0x1462   :  { %1803 = vmatprep.mubr.msk.f32.mxu1 %vm2009_vm0, %v2010_v2  ;;  %1902 = vmatpush3.bf16.msra.mxu1 %v1901_v8 }
0x1463   :  { %1903 = vmatprep.subr.bf16.mxu1 %v2008_v1 }
0x1466   :  { %1905 = vmatpush3.bf16.msra.mxu1 %v1904_v15 }
0x152c   :  { %v1128_v26 = vpop.f32.mrb[8].mxu1 }
0x152d   :  { %v1133_v27 = vrot.slane %v1128_v26, 2  ;;  %v1753_v28 = vpop.f32.mrb[9].mxu1 }
0x152f   :  { %v1135_v29 = vadd.f32 %v1133_v27, %v2093_v47  ;;  %v1145_v47 = vrot.slane %v1049_v11, 6 }
0x1531   :  { %v1536_v30 = vmul.f32 -1.442695, %v1135_v29 }
0x1533   :  { %1972 = vpow2.f32 %v1536_v30 }
0x1534   :  { %v2200_v31 = vpop.f32.mrb[10].mxu1  ;;  %1974 = vtanh.f32 %v1135_v29 }
0x1535   :  { %v1775_v60 = vpop.f32.mrb[11].mxu1 }
0x153d   :  { %v1973_v32 = vpop.eup %1972 }
0x153e   :  { %v1140_v33 = vadd.f32 1.0, %v1973_v32  ;;  %v1975_v34 = vpop.eup %1974 }
0x1540   :  { %1976 = vrcp.f32 %v1140_v33 }
0x154a   :  { %v1977_v36 = vpop.eup %1976 }
0x154b   :  { %v1143_v37 = vsel %vm2098_vm8, %v1975_v34, %v1977_v36 }
0x154c   :  { %1149 = vrot.lane.b32.xlu0 %v1143_v37, %s2011_s1  ;;  %v1147_v41 = vmul.f32 %v1145_v47, %v1143_v37 }
0x15be   :  { %v1150_v38 = vpop.permute.xlu0 %1149 }
0x15bf   :  { %v1152_v40 = vmul.f32 %v1150_v38, %v1143_v37 }
0x15c1   :  { %1154 = vrot.lane.b32.xlu1 %v1152_v40, %s2012_s2 }
0x1633   :  { %v1155_v42 = vpop.permute.xlu1 %1154 }
0x1634   :  { %v2206_v35 = vadd.f32 %v1155_v42, %v1147_v41 }
0x1636   :  { %1978 = vtanh.f32 %v2206_v35 }
0x1640   :  { %v1979_v48 = vpop.eup %1978 }
0x1641   :  { %1160 = vrot.lane.b32.xlu0 %v1979_v48, %s2011_s1 }
0x16b3   :  { %v1161_v50 = vpop.permute.xlu0 %1160 }
0x16b4   :  { %v1163_v51 = vmul.f32 %v1161_v50, %v1143_v37 }
0x16b6   :  { %v1173_v52 = vrot.slane %v1163_v51, 6  ;;  %1497 = vrot.lane.b32.xlu0 %v1163_v51, %s2012_s2 }
0x16b8   :  { %1174 = vrot.lane.b32.xlu1 %v1173_v52, %s2012_s2 }
0x172a   :  { %v1175_v59 = vpop.permute.xlu1 %1174 }
0x172b   :  { %1763 = vmatmul.mubr.msk.f32.vlgmr.msra.gmra.mrb[12].mxu0 %vm38_vm1, %v1175_v59 }
0x172c   :  { %1890 = vmatpush3.bf16.msra.mxu0 %v1889_v55  ;;  %1792 = vmatprep.mubr.msk.f32.mxu0 %vm2009_vm0, %v2010_v2 }
0x172d   :  { %1891 = vmatprep.subr.bf16.mxu0 %v2008_v1 }
0x1730   :  { %1893 = vmatpush3.bf16.msra.mxu0 %v1892_v61 }
0x1731   :  { %1894 = vmatprep.subr.bf16.mxu0 %v2008_v1 }
0x1734   :  { %1896 = vmatpush3.bf16.msra.mxu0 %v1895_v0 }
0x1735   :  { %1897 = vmatprep.subr.bf16.mxu0 %v2008_v1  ;;  %v1498_v1 = vpop.permute.xlu0 %1497 }
0x1736   :  { %v1500_v21 = vsel %vm38_vm1, %v1498_v1, %v2206_v35 }
0x1737   :  { %v1501_v22 = vsel %vm126_vm5, %v1500_v21, 0.0 }
0x1738   :  { %1899 = vmatpush3.bf16.msra.mxu0 %v1898_v5  ;;  %v1503_v25 = vrot.slane %v1501_v22, 4 }
0x17fe   :  { %v1244_v2 = vpop.f32.mrb[12].mxu0 }
0x17ff   :  { %v1318_v9 = vadd.f32 %v2200_v31, %v1244_v2  ;;  %v1764_v10 = vpop.f32.mrb[13].mxu0 }
0x1801   :  { %v1326_v11 = vadd.f32 %v1539_v49, %v1318_v9 }
0x1803   :  { %v1327_v12 = vmax.f32 %v1326_v11, 0.0 }
0x1805   :  { %1793 = vmatmul.mubr.msk.f32.vlgmr.msra.gmra.mrb[14].mxu0 %vm126_vm5, %v1327_v12 }
0x18d8   :  { %v1410_v17 = vpop.f32.mrb[14].mxu0 }
0x18d9   :  { %v1411_v18 = vadd.f32 %v1540_v16, %v1410_v17  ;;  %v1794_v19 = vpop.f32.mrb[15].mxu0 }
0x18db   :  { %v1414_v20 = vmax.f32 %v1411_v18, 0.0 }
0x18dd   :  { %1804 = vmatmul.mubr.msk.f32.vlgmr.msra.gmra.mrb[12].mxu1 %vm38_vm1, %v1414_v20 }
0x19b0   :  { %v1493_v24 = vpop.f32.mrb[12].mxu1 }
0x19b1   :  { %v1494_v26 = vadd.f32 %v1542_v23, %v1493_v24  ;;  %v1805_v27 = vpop.f32.mrb[13].mxu1 }
0x19b3   :  { %v1506_v28 = vsel %vm1505_vm9, %v1494_v26, %v1503_v25 }
0x19b4   :  { %1507 = vst [vmem:[%s2233_s3] sm:$0xf] %v1506_v28 }
0x19b5   :  { %1512 = vsyncpa [#allocation3], 1 }

</bundles_post_ra>
